<compile_context>
chip_gen: v7x
topology: tpu7x:2x2x1
jax: 0.10.0
libtpu: 0.0.40
codegen_flags: <defaults>
</compile_context>

<pallas_src>
import jax
import jax.numpy as jnp
from jax.experimental import pallas as pl
from jax.experimental.pallas import tpu as pltpu


# ----------------------------- Fused Pallas kernel ---------------------------

def fused_output_kernel(tl_ref, alb_ref, aub_ref, alow_t_ref, aup_t_ref,
                        xlb_ref, xub_ref, loss_ref):
    n, num_classes = alb_ref.shape
    num_layers = alow_t_ref.shape[0]
    tl = tl_ref[0]                          # true label (scalar, SMEM prefetch)

    class_ids = jax.lax.broadcasted_iota(jnp.int32, (n, num_classes), 1)
    is_true = class_ids == tl

    alb = alb_ref[...]
    aub = aub_ref[...]
    # true-label lower-bound column extracted via a masked lane reduce
    lb_col = jnp.sum(jnp.where(is_true, alb, 0.0), axis=1, keepdims=True)
    # diff coefficients in transposed layout [n, C]; the true-label column is
    # forced to zero so it concretizes to exactly 0 and adds hinge(0)=0.
    m = jnp.where(is_true, 0.0, lb_col - aub)

    def layer_step(l, m):
        pos = jnp.maximum(m, 0.0)
        neg = jnp.minimum(m, 0.0)
        idx = num_layers - 1 - l            # back-substitution walks layers in reverse
        # DeepPoly lower-bound rule (transposed): A_low^T @ pos + A_up^T @ neg
        return (jnp.dot(alow_t_ref[idx], pos, preferred_element_type=jnp.float32)
                + jnp.dot(aup_t_ref[idx], neg, preferred_element_type=jnp.float32))

    m = jax.lax.fori_loop(0, num_layers, layer_step, m, unroll=True)

    # concretize against the input box as lane-dense [1, C] matvecs (MXU path);
    # the trailing 1.0 entry of the box carries the bias term.
    pos = jnp.maximum(m, 0.0)
    neg = jnp.minimum(m, 0.0)
    lb_row = (jnp.dot(xlb_ref[...], pos, preferred_element_type=jnp.float32)
              + jnp.dot(xub_ref[...], neg, preferred_element_type=jnp.float32))

    # loss = sum(where(lb < 0, -lb, 0))  (hinge on bound violations)
    hinge = jnp.where(lb_row < 0.0, -lb_row, 0.0)
    loss_ref[...] = jnp.sum(hinge, keepdims=True)


def fused_output_forward(true_label_arr, alb, aub, a_low_t, a_up_t,
                         x_lb_row, x_ub_row):
    n, num_classes = alb.shape
    num_layers = a_low_t.shape[0]
    loss = pl.pallas_call(
        fused_output_kernel,
        out_shape=jax.ShapeDtypeStruct((1, 1), jnp.float32),
        grid_spec=pltpu.PrefetchScalarGridSpec(
            num_scalar_prefetch=1,          # true_label -> SMEM
            grid=(1,),
            in_specs=[
                pl.BlockSpec((n, num_classes), lambda i, tl: (0, 0)),
                pl.BlockSpec((n, num_classes), lambda i, tl: (0, 0)),
                pl.BlockSpec((num_layers, n, n), lambda i, tl: (0, 0, 0)),
                pl.BlockSpec((num_layers, n, n), lambda i, tl: (0, 0, 0)),
                pl.BlockSpec((1, n), lambda i, tl: (0, 0)),
                pl.BlockSpec((1, n), lambda i, tl: (0, 0)),
            ],
            out_specs=pl.BlockSpec((1, 1), lambda i, tl: (0, 0)),
        ),
        compiler_params=pltpu.CompilerParams(
            dimension_semantics=("arbitrary",)),
    )(true_label_arr, alb, aub, a_low_t, a_up_t, x_lb_row, x_ub_row)
    return loss[0, 0]


# ------------------------------ Module classes ------------------------------

class BacksubModule:
    """Synthetic back-substitution module.

    # TODO(synk): the original `backsub_module` is an external dependency whose
    # implementation is not given; a standard DeepPoly lower-bound
    # back-substitution (pos @ A_low + neg @ A_up per layer, then concretization
    # against the input box) is implemented here instead.
    """

    def __init__(self, a_low, a_up, x_lb_ext, x_ub_ext):
        n = a_low.shape[-1]
        # one-time preprocessing: transposed layer matrices + row-vector box so
        # the fused kernel needs no in-kernel transposes or per-call host glue.
        self.a_low_t = jnp.transpose(a_low, (0, 2, 1))   # [L, n, n]
        self.a_up_t = jnp.transpose(a_up, (0, 2, 1))     # [L, n, n]
        self.x_lb_row = x_lb_ext.reshape(1, n)           # [1, n]
        self.x_ub_row = x_ub_ext.reshape(1, n)           # [1, n]
        # NOTE: at realistic verifier sizes (hidden >~ 2k), add a contraction
        # tiling grid axis / bf16 A matrices (v7x 64 MiB VMEM) and a parallel
        # K axis; unnecessary at these shapes.


class Output:
    def __init__(self, backsub_module, true_label):
        self.backsub_module = backsub_module
        # pre-staged (1,) int32 for scalar prefetch
        self.true_label = jnp.array([true_label], dtype=jnp.int32)

    def forward(self, inputs):
        concrete_bounds, abstract_bounds = inputs   # concrete_bounds unused (as in torch)
        alb, aub = abstract_bounds
        bm = self.backsub_module
        return fused_output_forward(self.true_label, alb, aub,
                                    bm.a_low_t, bm.a_up_t,
                                    bm.x_lb_row, bm.x_ub_row)


# ------------------------------ Reference (JAX) ------------------------------

def reference_forward(abstract_bounds, true_label, a_low, a_up, x_lb_ext, x_ub_ext):
    alb, aub = abstract_bounds
    lb_col = alb[:, true_label:true_label + 1]
    cmp_ub = jnp.concatenate([aub[:, :true_label], aub[:, true_label + 1:]], axis=1)
    m = (lb_col - cmp_ub).T
    for l in reversed(range(a_low.shape[0])):
        pos, neg = jnp.maximum(m, 0.0), jnp.minimum(m, 0.0)
        m = pos @ a_low[l] + neg @ a_up[l]
    pos, neg = jnp.maximum(m, 0.0), jnp.minimum(m, 0.0)
    lb = jnp.sum(pos * x_lb_ext[None, :] + neg * x_ub_ext[None, :], axis=1)
    return jnp.sum(jnp.where(lb < 0.0, -lb, 0.0))


# ----------------------------------- Main ------------------------------------

if __name__ == "__main__":
    key = jax.random.PRNGKey(0)
    hidden, num_classes, n_layers, true_label = 16, 10, 3, 3
    n = hidden + 1  # coefficients + bias row

    k1, k2, k3, k4, k5, k6 = jax.random.split(key, 6)

    # abstract output-layer bounds (lower coeff matrix, upper coeff matrix)
    alb = jax.random.normal(k1, (n, num_classes), dtype=jnp.float32)
    aub = alb + jnp.abs(jax.random.normal(k2, (n, num_classes), dtype=jnp.float32))
    abstract_bounds = (alb, aub)
    cb = jax.random.normal(k3, (hidden,), dtype=jnp.float32)
    concrete_bounds = (cb, cb + 1.0)   # unused by forward, as in the torch code

    # synthetic relational bounds for the back-substitution layers
    base = 0.1 * jax.random.normal(k4, (n_layers, n, n), dtype=jnp.float32)
    delta = 0.05 * jnp.abs(jax.random.normal(k5, (n_layers, n, n), dtype=jnp.float32))
    bias_row = jnp.zeros((n,), jnp.float32).at[-1].set(1.0)
    a_low = (base - delta).at[:, -1, :].set(bias_row)
    a_up = (base + delta).at[:, -1, :].set(bias_row)

    # input box (+ trailing 1.0 bias slot)
    center = jax.random.normal(k6, (hidden,), dtype=jnp.float32)
    x_lb_ext = jnp.concatenate([center - 0.1, jnp.ones((1,), jnp.float32)])
    x_ub_ext = jnp.concatenate([center + 0.1, jnp.ones((1,), jnp.float32)])

    module = Output(BacksubModule(a_low, a_up, x_lb_ext, x_ub_ext), true_label)
    loss = module.forward((concrete_bounds, abstract_bounds))
    loss = jax.block_until_ready(loss)

    ref = reference_forward(abstract_bounds, true_label, a_low, a_up, x_lb_ext, x_ub_ext)
    assert jnp.allclose(loss, ref, rtol=2e-2, atol=1e-2), (float(loss), float(ref))

    print("KERNEL_OK")
</pallas_src>

<mosaic_0001>
module attributes {stable_mosaic.version = 11 : i64} {
  func.func @fused_output_kernel(%arg0: i32, %arg1: memref<1xi32, #tpu.memory_space<smem>>, %arg2: memref<17x10xf32, #tpu.memory_space<vmem>>, %arg3: memref<17x10xf32, #tpu.memory_space<vmem>>, %arg4: memref<3x17x17xf32, #tpu.memory_space<vmem>>, %arg5: memref<3x17x17xf32, #tpu.memory_space<vmem>>, %arg6: memref<1x17xf32, #tpu.memory_space<vmem>>, %arg7: memref<1x17xf32, #tpu.memory_space<vmem>>, %arg8: memref<1x1xf32, #tpu.memory_space<vmem>>) attributes {dimension_semantics = [#tpu.dimension_semantics<arbitrary>], iteration_bounds = array<i64: 1>, scalar_prefetch = 1 : i64, scratch_operands = 0 : i64, tpu.core_type = #tpu.core_type<tc>, window_params = [{pipeline_mode = #tpu.pipeline_mode<synchronous>, transform_indices = @transform_0, window_bounds = array<i64: 17, 10>}, {pipeline_mode = #tpu.pipeline_mode<synchronous>, transform_indices = @transform_1, window_bounds = array<i64: 17, 10>}, {pipeline_mode = #tpu.pipeline_mode<synchronous>, transform_indices = @transform_2, window_bounds = array<i64: 3, 17, 17>}, {pipeline_mode = #tpu.pipeline_mode<synchronous>, transform_indices = @transform_3, window_bounds = array<i64: 3, 17, 17>}, {pipeline_mode = #tpu.pipeline_mode<synchronous>, transform_indices = @transform_4, window_bounds = array<i64: 1, 17>}, {pipeline_mode = #tpu.pipeline_mode<synchronous>, transform_indices = @transform_5, window_bounds = array<i64: 1, 17>}, {pipeline_mode = #tpu.pipeline_mode<synchronous>, transform_indices = @transform_6, window_bounds = array<i64: 1, 1>}]} {
    %c0 = arith.constant 0 : index
    %0 = memref.load %arg1[%c0] : memref<1xi32, #tpu.memory_space<smem>>
    %1 = tpu.iota {dimensions = array<i32: 1>} : vector<17x10xi32>
    %2 = vector.broadcast %0 : i32 to vector<17x10xi32>
    %3 = arith.cmpi eq, %1, %2 : vector<17x10xi32>
    %c0_0 = arith.constant 0 : index
    %c0_1 = arith.constant 0 : index
    %4 = vector.load %arg2[%c0_0, %c0_1] : memref<17x10xf32, #tpu.memory_space<vmem>>, vector<17x10xf32>
    %c0_2 = arith.constant 0 : index
    %c0_3 = arith.constant 0 : index
    %5 = vector.load %arg3[%c0_2, %c0_3] : memref<17x10xf32, #tpu.memory_space<vmem>>, vector<17x10xf32>
    %cst = arith.constant 0.000000e+00 : f32
    %6 = vector.broadcast %cst : f32 to vector<17x10xf32>
    %7 = arith.select %3, %4, %6 : vector<17x10xi1>, vector<17x10xf32>
    %cst_4 = arith.constant dense<0.000000e+00> : vector<17xf32>
    %8 = vector.multi_reduction <add>, %7, %cst_4 [1] : vector<17x10xf32> to vector<17xf32>
    %9 = vector.shape_cast %8 : vector<17xf32> to vector<17x1xf32>
    %10 = vector.broadcast %9 : vector<17x1xf32> to vector<17x10xf32>
    %11 = arith.subf %10, %5 : vector<17x10xf32>
    %cst_5 = arith.constant 0.000000e+00 : f32
    %12 = vector.broadcast %cst_5 : f32 to vector<17x10xf32>
    %13 = arith.select %3, %12, %11 : vector<17x10xi1>, vector<17x10xf32>
    %c0_i32 = arith.constant 0 : i32
    %cst_6 = arith.constant 0.000000e+00 : f32
    %14 = vector.broadcast %cst_6 : f32 to vector<17x10xf32>
    %15 = arith.maximumf %13, %14 : vector<17x10xf32>
    %cst_7 = arith.constant 0.000000e+00 : f32
    %16 = vector.broadcast %cst_7 : f32 to vector<17x10xf32>
    %17 = arith.minimumf %13, %16 : vector<17x10xf32>
    %c2_i32 = arith.constant 2 : i32
    %18 = arith.subi %c2_i32, %c0_i32 : i32
    %19 = arith.index_cast %18 : i32 to index
    %c0_8 = arith.constant 0 : index
    %c0_9 = arith.constant 0 : index
    %20 = vector.load %arg4[%19, %c0_8, %c0_9] : memref<3x17x17xf32, #tpu.memory_space<vmem>>, vector<1x17x17xf32>
    %21 = vector.shape_cast %20 : vector<1x17x17xf32> to vector<17x17xf32>
    %cst_10 = arith.constant dense<0.000000e+00> : vector<17x10xf32>
    %22 = tpu.matmul %21, %15, %cst_10 {dimension_numbers = #tpu.dot_dimension_numbers<[1], [0], [0], [1], [0, 0, 1, 1], [], []>} : vector<17x17xf32>, vector<17x10xf32>, vector<17x10xf32> -> vector<17x10xf32>
    %23 = arith.index_cast %18 : i32 to index
    %c0_11 = arith.constant 0 : index
    %c0_12 = arith.constant 0 : index
    %24 = vector.load %arg5[%23, %c0_11, %c0_12] : memref<3x17x17xf32, #tpu.memory_space<vmem>>, vector<1x17x17xf32>
    %25 = vector.shape_cast %24 : vector<1x17x17xf32> to vector<17x17xf32>
    %cst_13 = arith.constant dense<0.000000e+00> : vector<17x10xf32>
    %26 = tpu.matmul %25, %17, %cst_13 {dimension_numbers = #tpu.dot_dimension_numbers<[1], [0], [0], [1], [0, 0, 1, 1], [], []>} : vector<17x17xf32>, vector<17x10xf32>, vector<17x10xf32> -> vector<17x10xf32>
    %27 = arith.addf %22, %26 : vector<17x10xf32>
    %c1_i32 = arith.constant 1 : i32
    %cst_14 = arith.constant 0.000000e+00 : f32
    %28 = vector.broadcast %cst_14 : f32 to vector<17x10xf32>
    %29 = arith.maximumf %27, %28 : vector<17x10xf32>
    %cst_15 = arith.constant 0.000000e+00 : f32
    %30 = vector.broadcast %cst_15 : f32 to vector<17x10xf32>
    %31 = arith.minimumf %27, %30 : vector<17x10xf32>
    %c2_i32_16 = arith.constant 2 : i32
    %32 = arith.subi %c2_i32_16, %c1_i32 : i32
    %33 = arith.index_cast %32 : i32 to index
    %c0_17 = arith.constant 0 : index
    %c0_18 = arith.constant 0 : index
    %34 = vector.load %arg4[%33, %c0_17, %c0_18] : memref<3x17x17xf32, #tpu.memory_space<vmem>>, vector<1x17x17xf32>
    %35 = vector.shape_cast %34 : vector<1x17x17xf32> to vector<17x17xf32>
    %cst_19 = arith.constant dense<0.000000e+00> : vector<17x10xf32>
    %36 = tpu.matmul %35, %29, %cst_19 {dimension_numbers = #tpu.dot_dimension_numbers<[1], [0], [0], [1], [0, 0, 1, 1], [], []>} : vector<17x17xf32>, vector<17x10xf32>, vector<17x10xf32> -> vector<17x10xf32>
    %37 = arith.index_cast %32 : i32 to index
    %c0_20 = arith.constant 0 : index
    %c0_21 = arith.constant 0 : index
    %38 = vector.load %arg5[%37, %c0_20, %c0_21] : memref<3x17x17xf32, #tpu.memory_space<vmem>>, vector<1x17x17xf32>
    %39 = vector.shape_cast %38 : vector<1x17x17xf32> to vector<17x17xf32>
    %cst_22 = arith.constant dense<0.000000e+00> : vector<17x10xf32>
    %40 = tpu.matmul %39, %31, %cst_22 {dimension_numbers = #tpu.dot_dimension_numbers<[1], [0], [0], [1], [0, 0, 1, 1], [], []>} : vector<17x17xf32>, vector<17x10xf32>, vector<17x10xf32> -> vector<17x10xf32>
    %41 = arith.addf %36, %40 : vector<17x10xf32>
    %c2_i32_23 = arith.constant 2 : i32
    %cst_24 = arith.constant 0.000000e+00 : f32
    %42 = vector.broadcast %cst_24 : f32 to vector<17x10xf32>
    %43 = arith.maximumf %41, %42 : vector<17x10xf32>
    %cst_25 = arith.constant 0.000000e+00 : f32
    %44 = vector.broadcast %cst_25 : f32 to vector<17x10xf32>
    %45 = arith.minimumf %41, %44 : vector<17x10xf32>
    %c2_i32_26 = arith.constant 2 : i32
    %46 = arith.subi %c2_i32_26, %c2_i32_23 : i32
    %47 = arith.index_cast %46 : i32 to index
    %c0_27 = arith.constant 0 : index
    %c0_28 = arith.constant 0 : index
    %48 = vector.load %arg4[%47, %c0_27, %c0_28] : memref<3x17x17xf32, #tpu.memory_space<vmem>>, vector<1x17x17xf32>
    %49 = vector.shape_cast %48 : vector<1x17x17xf32> to vector<17x17xf32>
    %cst_29 = arith.constant dense<0.000000e+00> : vector<17x10xf32>
    %50 = tpu.matmul %49, %43, %cst_29 {dimension_numbers = #tpu.dot_dimension_numbers<[1], [0], [0], [1], [0, 0, 1, 1], [], []>} : vector<17x17xf32>, vector<17x10xf32>, vector<17x10xf32> -> vector<17x10xf32>
    %51 = arith.index_cast %46 : i32 to index
    %c0_30 = arith.constant 0 : index
    %c0_31 = arith.constant 0 : index
    %52 = vector.load %arg5[%51, %c0_30, %c0_31] : memref<3x17x17xf32, #tpu.memory_space<vmem>>, vector<1x17x17xf32>
    %53 = vector.shape_cast %52 : vector<1x17x17xf32> to vector<17x17xf32>
    %cst_32 = arith.constant dense<0.000000e+00> : vector<17x10xf32>
    %54 = tpu.matmul %53, %45, %cst_32 {dimension_numbers = #tpu.dot_dimension_numbers<[1], [0], [0], [1], [0, 0, 1, 1], [], []>} : vector<17x17xf32>, vector<17x10xf32>, vector<17x10xf32> -> vector<17x10xf32>
    %55 = arith.addf %50, %54 : vector<17x10xf32>
    %c3_i32 = arith.constant 3 : i32
    %cst_33 = arith.constant 0.000000e+00 : f32
    %56 = vector.broadcast %cst_33 : f32 to vector<17x10xf32>
    %57 = arith.maximumf %55, %56 : vector<17x10xf32>
    %cst_34 = arith.constant 0.000000e+00 : f32
    %58 = vector.broadcast %cst_34 : f32 to vector<17x10xf32>
    %59 = arith.minimumf %55, %58 : vector<17x10xf32>
    %c0_35 = arith.constant 0 : index
    %c0_36 = arith.constant 0 : index
    %60 = vector.load %arg6[%c0_35, %c0_36] : memref<1x17xf32, #tpu.memory_space<vmem>>, vector<1x17xf32>
    %cst_37 = arith.constant dense<0.000000e+00> : vector<1x10xf32>
    %61 = tpu.matmul %60, %57, %cst_37 {dimension_numbers = #tpu.dot_dimension_numbers<[1], [0], [0], [1], [0, 0, 1, 1], [], []>} : vector<1x17xf32>, vector<17x10xf32>, vector<1x10xf32> -> vector<1x10xf32>
    %c0_38 = arith.constant 0 : index
    %c0_39 = arith.constant 0 : index
    %62 = vector.load %arg7[%c0_38, %c0_39] : memref<1x17xf32, #tpu.memory_space<vmem>>, vector<1x17xf32>
    %cst_40 = arith.constant dense<0.000000e+00> : vector<1x10xf32>
    %63 = tpu.matmul %62, %59, %cst_40 {dimension_numbers = #tpu.dot_dimension_numbers<[1], [0], [0], [1], [0, 0, 1, 1], [], []>} : vector<1x17xf32>, vector<17x10xf32>, vector<1x10xf32> -> vector<1x10xf32>
    %64 = arith.addf %61, %63 : vector<1x10xf32>
    %cst_41 = arith.constant 0.000000e+00 : f32
    %65 = vector.broadcast %cst_41 : f32 to vector<1x10xf32>
    %66 = arith.cmpf olt, %64, %65 : vector<1x10xf32>
    %cst_42 = arith.constant 0.000000e+00 : f32
    %67 = vector.broadcast %cst_42 : f32 to vector<1x10xf32>
    %68 = arith.subf %67, %64 : vector<1x10xf32>
    %cst_43 = arith.constant 0.000000e+00 : f32
    %69 = vector.broadcast %cst_43 : f32 to vector<1x10xf32>
    %70 = arith.select %66, %68, %69 : vector<1x10xi1>, vector<1x10xf32>
    %71 = vector.shape_cast %70 : vector<1x10xf32> to vector<1x1x10xf32>
    %cst_44 = arith.constant dense<0.000000e+00> : vector<1xf32>
    %72 = vector.multi_reduction <add>, %71, %cst_44 [1, 2] : vector<1x1x10xf32> to vector<1xf32>
    %73 = vector.shape_cast %72 : vector<1xf32> to vector<1x1x1xf32>
    %74 = vector.extract %73[0, 0, 0] : f32 from vector<1x1x1xf32>
    %75 = vector.broadcast %74 : f32 to vector<1x1xf32>
    %c0_45 = arith.constant 0 : index
    %c0_46 = arith.constant 0 : index
    %76 = vector.load %arg8[%c0_45, %c0_46] : memref<1x1xf32, #tpu.memory_space<vmem>>, vector<1x1xf32>
    tpu.vector_store %arg8[%c0_45, %c0_46], %75 {strides = array<i32>} : memref<1x1xf32, #tpu.memory_space<vmem>>, vector<1x1xf32>,
    return
  }
  func.func @transform_0(%arg0: i32, %arg1: memref<1xi32, #tpu.memory_space<smem>>) -> (i32, i32) {
    %c0_i32 = arith.constant 0 : i32
    %c0_i32_0 = arith.constant 0 : i32
    %c0_i32_1 = arith.constant 0 : i32
    return %c0_i32, %c0_i32_0 : i32, i32
  }
  func.func @transform_1(%arg0: i32, %arg1: memref<1xi32, #tpu.memory_space<smem>>) -> (i32, i32) {
    %c0_i32 = arith.constant 0 : i32
    %c0_i32_0 = arith.constant 0 : i32
    %c0_i32_1 = arith.constant 0 : i32
    return %c0_i32, %c0_i32_0 : i32, i32
  }
  func.func @transform_2(%arg0: i32, %arg1: memref<1xi32, #tpu.memory_space<smem>>) -> (i32, i32, i32) {
    %c0_i32 = arith.constant 0 : i32
    %c0_i32_0 = arith.constant 0 : i32
    %c0_i32_1 = arith.constant 0 : i32
    %c0_i32_2 = arith.constant 0 : i32
    return %c0_i32, %c0_i32_0, %c0_i32_1 : i32, i32, i32
  }
  func.func @transform_3(%arg0: i32, %arg1: memref<1xi32, #tpu.memory_space<smem>>) -> (i32, i32, i32) {
    %c0_i32 = arith.constant 0 : i32
    %c0_i32_0 = arith.constant 0 : i32
    %c0_i32_1 = arith.constant 0 : i32
    %c0_i32_2 = arith.constant 0 : i32
    return %c0_i32, %c0_i32_0, %c0_i32_1 : i32, i32, i32
  }
  func.func @transform_4(%arg0: i32, %arg1: memref<1xi32, #tpu.memory_space<smem>>) -> (i32, i32) {
    %c0_i32 = arith.constant 0 : i32
    %c0_i32_0 = arith.constant 0 : i32
    %c0_i32_1 = arith.constant 0 : i32
    return %c0_i32, %c0_i32_0 : i32, i32
  }
  func.func @transform_5(%arg0: i32, %arg1: memref<1xi32, #tpu.memory_space<smem>>) -> (i32, i32) {
    %c0_i32 = arith.constant 0 : i32
    %c0_i32_0 = arith.constant 0 : i32
    %c0_i32_1 = arith.constant 0 : i32
    return %c0_i32, %c0_i32_0 : i32, i32
  }
  func.func @transform_6(%arg0: i32, %arg1: memref<1xi32, #tpu.memory_space<smem>>) -> (i32, i32) {
    %c0_i32 = arith.constant 0 : i32
    %c0_i32_0 = arith.constant 0 : i32
    %c0_i32_1 = arith.constant 0 : i32
    return %c0_i32, %c0_i32_0 : i32, i32
  }
}

</mosaic_0001>

<bundles_post_ra>
// kernel: tpu_custom_call.1
= control target key start
LH: loop header
LB: loop body
LE: loop exit
PB: predicated region body
PF: predicated region fallthrough
CT: control target
= control target key end

     0   :  { %v27_v0 = vlaneseq  ;;  %s1351_s0 = inlined_call_operand.<no memory space> [shape: s32[1], index: 0, kind: input, shape index: {}]   ;;  %s1352_s1 = inlined_call_operand.vmem [shape: f32[17,10], index: 1, kind: input, shape index: {}]   ;;  %s1353_s2 = inlined_call_operand.vmem [shape: f32[17,10], index: 2, kind: input, shape index: {}]   ;;  %s1354_s3 = inlined_call_operand.vmem [shape: f32[3,17,17], index: 3, kind: input, shape index: {}]   ;;  %s1355_s4 = inlined_call_operand.vmem [shape: f32[3,17,17], index: 4, kind: input, shape index: {}]   ;;  %s1356_s5 = inlined_call_operand.vmem [shape: f32[1,17], index: 5, kind: input, shape index: {}]   ;;  %s1357_s6 = inlined_call_operand.vmem [shape: f32[1,17], index: 6, kind: input, shape index: {}]   ;;  %s1358_s7 = inlined_call_operand.hbm [shape: f32[1,1], index: 7, kind: output, shape index: {}]  }
   0x1   :  { %v29_v1 = vstv %s1351_s0 }
   0x2   :  { %13 = vsyncpa [#allocation5], 0  ;;  %v28_v2 = vand.u32 127, %v27_v0  ;;  %v31_v3 = vld [vmem:[%s1352_s1] sm:$0xff]  ;;  %v32_v4 = vld [vmem:[%s1352_s1 + $0x8] sm:$0xff]  ;;  %vm40_vm0 = vcmask 80896  }
   0x3   :  { %v33_v5 = vld [vmem:[%s1352_s1 + $0x10] sm:$0x1]  ;;  %vm47_vm1 = vcmask 73728   ;;  %v1109_v13 = vmov 0.0|0.0   ;;  %vm1110_vm3 = vmmov 0   ;;  %v1111_v14 = vmov 0.0  }
   0x4   :  { %vm1165_vm2 = vcmp.eq.s32.totalorder %v28_v2, %v29_v1  ;;  %1033 = vmatprep.subr.bf16.mxu0 %v1109_v13  ;;  %1039 = vmatprep.subr.bf16.mxu1 %v1109_v13  ;;  %v34_v15 = vld [vmem:[%s1353_s2] sm:$0xff]  ;;  %v35_v18 = vld [vmem:[%s1353_s2 + $0x8] sm:$0xff]  ;;  %v36_v19 = vld [vmem:[%s1353_s2 + $0x10] sm:$0x1]  ;;  %vm81_vm4 = vcmask 1040384   ;;  %vm71_vm5 = vcmask 138240  }
   0x5   :  { %v37_v7 = vsel %vm1165_vm2, %v31_v3, 0.0  ;;  %v38_v8 = vsel %vm1165_vm2, %v32_v4, 0.0  ;;  %v39_v9 = vsel %vm1165_vm2, %v33_v5, 0.0  ;;  %931 = vmatprep.mubr.msk.f32.mxu0 %vm1110_vm3, %v1111_v14  ;;  %961 = vmatprep.mubr.msk.f32.mxu1 %vm1110_vm3, %v1111_v14  ;;  %v844_v33 = vld [vmem:[%s1355_s4 + $0x30] sm:$0xff]  ;;  %v845_v35 = vld [vmem:[%s1355_s4 + $0x38] sm:$0xff]  ;;  %v859_v55 = vld [vmem:[%s1355_s4 + $0x20] sm:$0xff] }
   0x6   :  { %v41_v10 = vsel %vm40_vm0, %v37_v7, 0.0  ;;  %v48_v11 = vsel %vm47_vm1, %v39_v9, 0.0  ;;  %v44_v12 = vsel %vm40_vm0, %v38_v8, 0.0  ;;  %v846_v37 = vld [vmem:[%s1355_s4 + $0x40] sm:$0x1]  ;;  %v841_v38 = vld [vmem:[%s1354_s3 + $0x30] sm:$0xff] }
   0x7   :  { %42 = vadd.xlane.f32.xlu0 %v41_v10  ;;  %49 = vadd.xlane.f32.xlu1 %v48_v11  ;;  %v842_v39 = vld [vmem:[%s1354_s3 + $0x38] sm:$0xff]  ;;  %v843_v40 = vld [vmem:[%s1354_s3 + $0x40] sm:$0x1]  ;;  %v860_v57 = vld [vmem:[%s1355_s4 + $0x28] sm:$0x1]  ;;  %vm825_vm7 = vcmask 0  }
   0x8   :  { %v858_v54 = vld [vmem:[%s1355_s4 + $0x18] sm:$0xff]  ;;  %v856_v59 = vld [vmem:[%s1354_s3 + $0x20] sm:$0xff]  ;;  %v857_v60 = vld [vmem:[%s1354_s3 + $0x28] sm:$0x1] }
   0x9   :  { %v855_v58 = vld [vmem:[%s1354_s3 + $0x18] sm:$0xff]  ;;  %v464_v11 = vld [vmem:[%s1355_s4] sm:$0xff] }
   0xb   :  { %45 = vadd.xlane.f32.xlu0 %v44_v12  ;;  %v462_v12 = vld [vmem:[%s1354_s3 + $0x8] sm:$0xff] }
  0x94   :  { %v43_v16 = vpop.xlane.xlu0 %42  ;;  %v50_v20 = vpop.xlane.xlu1 %49 }
  0x95   :  { %v51_v17 = vsub.f32 %v43_v16, %v34_v15  ;;  %v53_v24 = vsub.f32 %v50_v20, %v36_v19  ;;  %v465_v15 = vld [vmem:[%s1355_s4 + $0x8] sm:$0xff]  ;;  %v463_v16 = vld [vmem:[%s1354_s3 + $0x10] sm:$0x1] }
  0x97   :  { %v54_v22 = vsel %vm1165_vm2, 0.0, %v51_v17  ;;  %v56_v28 = vsel %vm1165_vm2, 0.0, %v53_v24  ;;  %v466_v17 = vld [vmem:[%s1355_s4 + $0x10] sm:$0x1] }
  0x98   :  { %v46_v21 = vpop.xlane.xlu0 %45  ;;  %v60_v26 = vmin.f32 %v54_v22, 0.0  ;;  %v62_v31 = vmin.f32 %v56_v28, 0.0  ;;  %v57_v32 = vmax.f32 %v54_v22, 0.0  ;;  %v59_v36 = vmax.f32 %v56_v28, 0.0 }
  0x99   :  { %v52_v23 = vsub.f32 %v46_v21, %v35_v18  ;;  %v461_v18 = vld [vmem:[%s1354_s3] sm:$0xff] }
  0x9b   :  { %v55_v25 = vsel %vm1165_vm2, 0.0, %v52_v23 }
  0x9c   :  { %v61_v27 = vmin.f32 %v55_v25, 0.0  ;;  %v58_v30 = vmax.f32 %v55_v25, 0.0 }
  0x9e   :  { %v1034_v29 = vpack.c.bf16 %v61_v27, %v60_v26  ;;  %v1037_v34 = vpack.c.bf16 %v58_v30, %v57_v32 }
  0xa0   :  { %1035 = vmatpush3.bf16.msra.mxu0 %v1034_v29 }
  0xa1   :  { %929 = vmatprep.subr.mxu0 %v1111_v14 }
  0xa4   :  { %930 = vmatpush3.msk.msra.mxu0 %vm81_vm4, %v62_v31 }
  0xa5   :  { %932 = vmatmul.mubr.msk.f32.vlgmr.msra.gmra.mrb[0].mxu0 %vm71_vm5, %v844_v33  ;;  %1036 = vmatprep.subr.bf16.mxu0 %v1109_v13 }
  0xa6   :  { %1038 = vmatpush3.bf16.msra.mxu0 %v1037_v34  ;;  %934 = vmatprep.mubr.msk.f32.mxu0 %vm1110_vm3, %v1111_v14 }
  0xa7   :  { %944 = vmatprep.subr.mxu0 %v1111_v14 }
  0xa9   :  { %935 = vmatmul.mubr.msk.f32.gmra.mrb[2].mxu0 %vm71_vm5, %v845_v35 }
  0xaa   :  { %945 = vmatpush3.msk.msra.mxu0 %vm81_vm4, %v59_v36  ;;  %937 = vmatprep.mubr.msk.f32.mxu0 %vm1110_vm3, %v1111_v14 }
  0xab   :  { %1045 = vmatprep.subr.bf16.mxu0 %v1109_v13 }
  0xad   :  { %938 = vmatmul.mubr.msk.f32.gmra.mrb[4].mxu0 %vm71_vm5, %v846_v37 }
  0xae   :  { %946 = vmatprep.mubr.msk.f32.mxu0 %vm1110_vm3, %v1111_v14 }
  0xb1   :  { %947 = vmatmul.mubr.msk.f32.vlgmr.msra.gmra.mrb[0].mxu0 %vm71_vm5, %v841_v38  ;;  %v658_v38 = vld [vmem:[%s1357_s6] sm:$0x1]  ;;  %s1112_s6 = smov [#allocation4]  }
  0xb2   :  { %949 = vmatprep.mubr.msk.f32.mxu0 %vm1110_vm3, %v1111_v14 }
  0xb5   :  { %950 = vmatmul.mubr.msk.f32.gmra.mrb[2].mxu0 %vm71_vm5, %v842_v39 }
  0xb6   :  { %952 = vmatprep.mubr.msk.f32.mxu0 %vm1110_vm3, %v1111_v14 }
  0xb9   :  { %953 = vmatmul.mubr.msk.f32.gmra.mrb[4].mxu0 %vm71_vm5, %v843_v40  ;;  %v657_v40 = vld [vmem:[%s1356_s5] sm:$0x1]  ;;  %s833_s5 = sshll.u32 %s1112_s6, 4  ;;  %s834_s5 = int_to_ptr.vmem [resolvable:$true] %s833_s5 }
  0xba   :  { %991 = vmatprep.mubr.msk.f32.mxu0 %vm1110_vm3, %v1111_v14  ;;  %s1085_s25 = scalar_lea.vmem %s834_s5, 16  ;;  %s1089_s26 = scalar_lea.vmem %s834_s5, 32 }
  0xbb   :  { %p1086_p0 = scmp.ne.s32.totalorder %s834_s5, %s1085_s25  ;;  %p1090_p1 = scmp.lt.s32.totalorder %s834_s5, %s834_s5 }
  0xbc   :  { %p1091_p2 = scmp.lt.s32.totalorder %s1089_s26, %s1085_s25 }
  0xbe   :  { %p1092_p3 = por %p1091_p2, %p1090_p1 }
  0xc0   :  { %p1093_p4 = pnand %p1092_p3, %p1086_p0 }
 0x184   :  { %v243_v41 = vpop.f32.mrb[0].mxu0 }
 0x185   :  { %v948_v42 = vpop.f32.mrb[1].mxu0  ;;  %v257_v44 = vmax.f32 %v243_v41, 0.0  ;;  %v260_v45 = vmin.f32 %v243_v41, 0.0 }
 0x188   :  { %v248_v43 = vpop.f32.mrb[2].mxu0 }
 0x189   :  { %v258_v46 = vmax.f32 %v248_v43, 0.0  ;;  %v261_v47 = vmin.f32 %v248_v43, 0.0  ;;  %v951_v48 = vpop.f32.mrb[3].mxu0 }
 0x18b   :  { %v1043_v49 = vpack.c.bf16 %v258_v46, %v257_v44  ;;  %v1040_v50 = vpack.c.bf16 %v261_v47, %v260_v45 }
 0x18c   :  { %v253_v51 = vpop.f32.mrb[4].mxu0 }
 0x18d   :  { %v954_v52 = vpop.f32.mrb[5].mxu0  ;;  %1041 = vmatpush3.bf16.msra.mxu1 %v1040_v50  ;;  %v262_v53 = vmin.f32 %v253_v51, 0.0  ;;  %v259_v56 = vmax.f32 %v253_v51, 0.0 }
 0x18e   :  { %959 = vmatprep.subr.mxu1 %v1111_v14 }
 0x191   :  { %960 = vmatpush3.msk.msra.mxu1 %vm81_vm4, %v262_v53 }
 0x192   :  { %962 = vmatmul.mubr.msk.f32.vlgmr.msra.gmra.mrb[0].mxu1 %vm71_vm5, %v858_v54  ;;  %1042 = vmatprep.subr.bf16.mxu1 %v1109_v13 }
 0x193   :  { %1044 = vmatpush3.bf16.msra.mxu1 %v1043_v49  ;;  %964 = vmatprep.mubr.msk.f32.mxu1 %vm1110_vm3, %v1111_v14 }
 0x194   :  { %974 = vmatprep.subr.mxu1 %v1111_v14 }
 0x196   :  { %965 = vmatmul.mubr.msk.f32.gmra.mrb[2].mxu1 %vm71_vm5, %v859_v55 }
 0x197   :  { %975 = vmatpush3.msk.msra.mxu1 %vm81_vm4, %v259_v56  ;;  %967 = vmatprep.mubr.msk.f32.mxu1 %vm1110_vm3, %v1111_v14 }
 0x198   :  { %1057 = vmatprep.subr.bf16.mxu1 %v1109_v13 }
 0x19a   :  { %968 = vmatmul.mubr.msk.f32.gmra.mrb[4].mxu1 %vm71_vm5, %v860_v57 }
 0x19b   :  { %976 = vmatprep.mubr.msk.f32.mxu1 %vm1110_vm3, %v1111_v14 }
 0x19e   :  { %977 = vmatmul.mubr.msk.f32.vlgmr.msra.gmra.mrb[0].mxu1 %vm71_vm5, %v855_v58 }
 0x19f   :  { %979 = vmatprep.mubr.msk.f32.mxu1 %vm1110_vm3, %v1111_v14 }
 0x1a2   :  { %980 = vmatmul.mubr.msk.f32.gmra.mrb[2].mxu1 %vm71_vm5, %v856_v59 }
 0x1a3   :  { %982 = vmatprep.mubr.msk.f32.mxu1 %vm1110_vm3, %v1111_v14 }
 0x1a6   :  { %983 = vmatmul.mubr.msk.f32.gmra.mrb[4].mxu1 %vm71_vm5, %v857_v60 }
 0x1a7   :  { %1009 = vmatprep.mubr.msk.f32.mxu1 %vm1110_vm3, %v1111_v14 }
 0x271   :  { %v441_v61 = vpop.f32.mrb[0].mxu1 }
 0x272   :  { %v978_v62 = vpop.f32.mrb[1].mxu1  ;;  %v455_v0 = vmax.f32 %v441_v61, 0.0  ;;  %v458_v1 = vmin.f32 %v441_v61, 0.0 }
 0x275   :  { %v446_v63 = vpop.f32.mrb[2].mxu1 }
 0x276   :  { %v456_v2 = vmax.f32 %v446_v63, 0.0  ;;  %v459_v3 = vmin.f32 %v446_v63, 0.0  ;;  %v981_v4 = vpop.f32.mrb[3].mxu1 }
 0x278   :  { %v1046_v5 = vpack.c.bf16 %v459_v3, %v458_v1  ;;  %v1049_v6 = vpack.c.bf16 %v456_v2, %v455_v0 }
 0x279   :  { %v451_v7 = vpop.f32.mrb[4].mxu1 }
 0x27a   :  { %v984_v8 = vpop.f32.mrb[5].mxu1  ;;  %1047 = vmatpush3.bf16.msra.mxu0 %v1046_v5  ;;  %1059 = vmatpush3.bf16.msra.mxu1 %v1049_v6  ;;  %v457_v9 = vmax.f32 %v451_v7, 0.0  ;;  %v460_v10 = vmin.f32 %v451_v7, 0.0 }
 0x27b   :  { %989 = vmatprep.subr.mxu0 %v1111_v14  ;;  %1058 = vmatprep.subr.mxu1 %v1111_v14 }
 0x27e   :  { %990 = vmatpush3.msk.msra.mxu0 %vm81_vm4, %v460_v10  ;;  %1060 = vmatpush3.msk.msra.mxu1 %vm81_vm4, %v457_v9 }
 0x27f   :  { %992 = vmatmul.mubr.msk.f32.vlgmr.msra.gmra.mrb[6].mxu0 %vm71_vm5, %v464_v11  ;;  %1048 = vmatprep.subr.bf16.mxu0 %v1109_v13 }
 0x280   :  { %1050 = vmatpush3.bf16.msra.mxu0 %v1049_v6  ;;  %994 = vmatprep.mubr.msk.f32.mxu0 %vm1110_vm3, %v1111_v14 }
 0x281   :  { %1004 = vmatprep.subr.mxu0 %v1111_v14  ;;  %1010 = vmatmul.mubr.msk.f32.vlgmr.msra.gmra.mrb[6].mxu1 %vm71_vm5, %v462_v12 }
 0x282   :  { %1012 = vmatprep.mubr.msk.f32.mxu1 %vm1110_vm3, %v1111_v14  ;;  %1051 = vmatprep.subr.bf16.mxu1 %v1109_v13 }
 0x283   :  { %995 = vmatmul.mubr.msk.f32.gmra.mrb[8].mxu0 %vm71_vm5, %v465_v15 }
 0x284   :  { %1005 = vmatpush3.msk.msra.mxu0 %vm81_vm4, %v457_v9  ;;  %997 = vmatprep.mubr.msk.f32.mxu0 %vm1110_vm3, %v1111_v14 }
 0x285   :  { %1013 = vmatmul.mubr.msk.f32.gmra.mrb[8].mxu1 %vm71_vm5, %v463_v16 }
 0x286   :  { %1021 = vmatprep.mubr.msk.f32.mxu1 %vm1110_vm3, %v1111_v14 }
 0x287   :  { %998 = vmatmul.mubr.msk.f32.gmra.mrb[10].mxu0 %vm71_vm5, %v466_v17 }
 0x288   :  { %1006 = vmatprep.mubr.msk.f32.mxu0 %vm1110_vm3, %v1111_v14 }
 0x28b   :  { %1007 = vmatmul.mubr.msk.f32.vlgmr.msra.gmra.mrb[6].mxu0 %vm71_vm5, %v461_v18 }
 0x354   :  { %v642_v19 = vpop.f32.mrb[6].mxu1 }
 0x355   :  { %v1011_v20 = vpop.f32.mrb[7].mxu1 }
 0x356   :  { %v550_v21 = vpop.f32.mrb[8].mxu0 }
 0x357   :  { %v996_v22 = vpop.f32.mrb[9].mxu0  ;;  %v643_v23 = vadd.f32 %v642_v19, %v550_v21 }
 0x358   :  { %v647_v24 = vpop.f32.mrb[8].mxu1 }
 0x359   :  { %v1014_v25 = vpop.f32.mrb[9].mxu1  ;;  %v652_v30 = vmax.f32 %v643_v23, 0.0  ;;  %v655_v31 = vmin.f32 %v643_v23, 0.0 }
 0x35a   :  { %v555_v26 = vpop.f32.mrb[10].mxu0 }
 0x35b   :  { %v999_v27 = vpop.f32.mrb[11].mxu0  ;;  %v648_v28 = vadd.f32 %v647_v24, %v555_v26 }
 0x35d   :  { %v656_v37 = vmin.f32 %v648_v28, 0.0  ;;  %v653_v39 = vmax.f32 %v648_v28, 0.0 }
 0x35e   :  { %v637_v29 = vpop.f32.mrb[6].mxu0 }
 0x35f   :  { %v651_v32 = vmax.f32 %v637_v29, 0.0  ;;  %v654_v33 = vmin.f32 %v637_v29, 0.0  ;;  %v1008_v34 = vpop.f32.mrb[7].mxu0 }
 0x361   :  { %v1052_v35 = vpack.c.bf16 %v655_v31, %v654_v33  ;;  %v1055_v36 = vpack.c.bf16 %v652_v30, %v651_v32 }
 0x363   :  { %1053 = vmatpush3.bf16.msra.mxu1 %v1052_v35 }
 0x364   :  { %1019 = vmatprep.subr.mxu1 %v1111_v14 }
 0x367   :  { %1020 = vmatpush3.msk.msra.mxu1 %vm81_vm4, %v656_v37 }
 0x368   :  { %1022 = vmatmul.mubr.msk.f32.vlgmr.msra.gmra.mrb[10].mxu1 %vm71_vm5, %v658_v38  ;;  %1054 = vmatprep.subr.bf16.mxu1 %v1109_v13 }
 0x369   :  { %1056 = vmatpush3.bf16.msra.mxu1 %v1055_v36  ;;  %1030 = vmatprep.mubr.msk.f32.mxu1 %vm1110_vm3, %v1111_v14 }
 0x36a   :  { %1028 = vmatprep.subr.mxu1 %v1111_v14 }
 0x36d   :  { %1029 = vmatpush3.msk.msra.mxu1 %vm81_vm4, %v653_v39 }
 0x370   :  { %1031 = vmatmul.mubr.msk.f32.vlgmr.msra.gmra.mrb[10].mxu1 %vm71_vm5, %v657_v40 }
 0x443   :  { %v807_v41 = vpop.f32.mrb[10].mxu1 }
 0x444   :  { %vm811_vm6 = vcmp.lt.f32.partialorder %v807_v41, 0.0  ;;  %v812_v42 = vsub.f32 0.0, %v807_v41  ;;  %v1032_v43 = vpop.f32.mrb[11].mxu1 }
 0x446   :  { %v813_v13 = vsel %vm811_vm6, %v812_v42, 0.0 }
 0x447   :  { %v814_v44 = vsel %vm47_vm1, %v813_v13, 0.0 }
 0x448   :  { %815 = vadd.xlane.f32.xlu1 %v814_v44 }
 0x4d5   :  { %v816_v45 = vpop.xlane.xlu1 %815 }
 0x4d6   :  { %v817_v46 = vrot.slane %v816_v45, 4 }
 0x4d8   :  { %v818_v14 = vadd.f32 %v817_v46, %v816_v45 }
 0x4da   :  { %v819_v47 = vrot.slane %v818_v14, 2 }
 0x4dc   :  { %v820_v48 = vadd.f32 %v819_v47, %v818_v14 }
 0x4de   :  { %v821_v49 = vrot.slane %v820_v48, 1 }
 0x4e0   :  { %v822_v50 = vadd.f32 %v821_v49, %v820_v48 }
 0x4e2   :  { %1079 = vpush %v822_v50 }
 0x513   :  { %s1080_s24 = spop %1079 }
 0x514   :  { %v824_v51 = vstv %s1080_s24 }
 0x515   :  { %826 = vst.msk [vmem:[#allocation4] sm:$0x1] %vm825_vm7, %v824_v51 }
 0x516   :  { %1096 = shalt.err (!%p1093_p4)
}
 0x517   :  { %s1097_s29 = scalar_lea.hbm %s1358_s7, 16 }
 0x518   :  { %p1098_p5 = scmp.ne.s32.totalorder %s1358_s7, %s1097_s29  ;;  %p1101_p6 = scmp.lt.u32.totalorder %s1097_s29, %s1358_s7 }
 0x51a   :  { %p1103_p7 = pnand %p1101_p6, %p1098_p5 }
 0x51c   :  { %1106 = shalt.err (!%p1103_p7)
}
 0x51d   :  { %836 = dma.vmem_to_hbm [thread:$0]  %s834_s5, 16, %s1358_s7, [#allocation5]  }
 0x51e   :  { %1107 = dma.done.wait [#allocation5], 16  }
 0x51f   :  { %1108 = vsyncadd [#allocation5], 4294967280 }
 0x520   :  { %840 = vsyncpa [#allocation5], 1 }

</bundles_post_ra>
